<compile_context>
chip_gen: v7x
topology: tpu7x:2x2x1
jax: 0.10.0
libtpu: 0.0.40
codegen_flags: <defaults>
</compile_context>

<pallas_src>
import functools

import jax
import jax.numpy as jnp
from jax.experimental import pallas as pl
from jax.experimental.pallas import tpu as pltpu

OUT_W = 128  # lane-dense packed output width: [mu | sigma | zero pad]


def encoder_kernel(x_ref, w1_ref, b1_ref, wh_ref, bh_ref, out_ref, *,
                   latent_dim):
    """Single invocation: full first Linear + fused heads + sigma epilogue.

    x_ref  : [B, D]      input (flattened image)
    w1_ref : [D, H]      W1.T (pre-transposed parameter)
    b1_ref : [1, H]      b1
    wh_ref : [H, OUT_W]  [Wmu.T | 0.5*Wlv.T | zero pad]  (OUT_W = 128)
    bh_ref : [1, OUT_W]  [bmu   | 0.5*blv   | zero pad]
    out_ref: [B, OUT_W]  columns [0, L) = mu, [L, 2L) = sigma, rest padding
    """
    # First Linear + ReLU, kept entirely in vregs (no scratch round trip).
    h = jnp.maximum(
        jnp.dot(x_ref[...], w1_ref[...], preferred_element_type=jnp.float32)
        + b1_ref[...],
        0.0,
    )

    # Fused mu / (0.5*logvar) heads in one MXU call (0.5 folded into weights).
    heads = jnp.dot(h, wh_ref[...],
                    preferred_element_type=jnp.float32) + bh_ref[...]

    # Columns < L are mu (identity); columns >= L are 0.5*logvar -> sigma.
    # NOTE: exp() is evaluated on the mu / pad columns too, then discarded by
    # the select (pad columns become exp(0)=1 and are sliced off in the
    # wrapper).  Keep this a jnp.where, NOT arithmetic masking, so any inf/nan
    # from exp on mu columns can never leak into the mu output.
    col = jax.lax.broadcasted_iota(jnp.int32, heads.shape, 1)
    out_ref[...] = jnp.where(col < latent_dim, heads,
                             jnp.exp(heads)).astype(out_ref.dtype)


@functools.partial(jax.jit, static_argnames=("latent_dim",))
def encoder_forward_packed(x, w1_t, b1, w_heads, b_heads, *, latent_dim):
    """Returns the packed [B, 128] slab: [:, :L] = mu, [:, L:2L] = sigma.

    x: [B, D]; w1_t: [D, H]; b1: [1, H]; w_heads: [H, 128]; b_heads: [1, 128].
    Single-step kernel: no grid, whole-array VMEM BlockSpecs.
    """
    B = x.shape[0]
    vmem = pltpu.MemorySpace.VMEM
    return pl.pallas_call(
        functools.partial(encoder_kernel, latent_dim=latent_dim),
        out_shape=jax.ShapeDtypeStruct((B, OUT_W), jnp.float32),
        in_specs=[
            pl.BlockSpec(memory_space=vmem),   # x (full slab)
            pl.BlockSpec(memory_space=vmem),   # W1.T
            pl.BlockSpec(memory_space=vmem),   # b1
            pl.BlockSpec(memory_space=vmem),   # fused head weights
            pl.BlockSpec(memory_space=vmem),   # fused head biases
        ],
        out_specs=pl.BlockSpec(memory_space=vmem),
    )(x, w1_t, b1, w_heads, b_heads)


def encoder_forward(x, w1_t, b1, w_heads, b_heads, *, latent_dim):
    """Module-API wrapper returning (mu, sigma).

    Downstream code that immediately consumes both (e.g. z = mu + sigma*eps)
    should prefer encoder_forward_packed and slice/fuse there, to avoid the
    extra HBM round trip of the two sub-128-lane slices.
    """
    packed = encoder_forward_packed(x, w1_t, b1, w_heads, b_heads,
                                    latent_dim=latent_dim)
    mu = packed[:, :latent_dim]
    sigma = packed[:, latent_dim:2 * latent_dim]
    return mu, sigma


def pack_head_params(wmu, bmu, wlv, blv, hidden_dim, latent_dim, out_w=OUT_W):
    """Pack the two head Linears into one lane-dense [H, out_w] weight/bias.

    The 0.5 of exp(0.5*logvar) is folded into the logvar half here
    (power-of-two scale => bit-exact).  Call once and cache; do not rebuild
    per forward.
    """
    w_heads = jnp.zeros((hidden_dim, out_w), jnp.float32)
    w_heads = w_heads.at[:, :latent_dim].set(wmu.T)
    w_heads = w_heads.at[:, latent_dim:2 * latent_dim].set(0.5 * wlv.T)
    b_heads = jnp.zeros((1, out_w), jnp.float32)
    b_heads = b_heads.at[0, :latent_dim].set(bmu)
    b_heads = b_heads.at[0, latent_dim:2 * latent_dim].set(0.5 * blv)
    return w_heads, b_heads


def init_linear(key, in_features, out_features):
    """Deterministic PyTorch-style uniform(-1/sqrt(fan_in), 1/sqrt(fan_in)) init."""
    kw, kb = jax.random.split(key)
    bound = 1.0 / jnp.sqrt(jnp.float32(in_features))
    w = jax.random.uniform(kw, (out_features, in_features), jnp.float32,
                           -bound, bound)
    b = jax.random.uniform(kb, (out_features,), jnp.float32, -bound, bound)
    return w, b


def reference_forward(x, w1, b1, wmu, bmu, wlv, blv):
    h = jnp.maximum(x @ w1.T + b1, 0.0)
    mu = h @ wmu.T + bmu
    sigma = jnp.exp(0.5 * (h @ wlv.T + blv))
    return mu, sigma


if __name__ == "__main__":
    # Small shapes consistent with the module: image SIZE x SIZE x 3 flattened.
    B = 4
    SIZE = 16
    input_dim = SIZE * SIZE * 3     # 768
    hidden_dim = 32
    latent_dim = 10

    key = jax.random.PRNGKey(0)
    kx, k1, k2, k3 = jax.random.split(key, 4)

    # Input: NCHW image flattened per-sample (PyTorch x.view(B, -1) convention).
    img = jax.random.normal(kx, (B, 3, SIZE, SIZE), jnp.float32)
    x = img.reshape(B, -1)

    w1, b1 = init_linear(k1, input_dim, hidden_dim)
    wmu, bmu = init_linear(k2, hidden_dim, latent_dim)
    wlv, blv = init_linear(k3, hidden_dim, latent_dim)

    # Parameter prep done ONCE, outside the jitted forward: pre-transposed W1
    # and the cached fused-head pack (with the 0.5 folded in).
    w1_t = jnp.asarray(w1.T)                       # (D, H)
    b1_row = b1.reshape(1, hidden_dim)             # (1, H)
    w_heads, b_heads = pack_head_params(wmu, bmu, wlv, blv,
                                        hidden_dim, latent_dim)
    w1_t, b1_row, w_heads, b_heads = jax.block_until_ready(
        (w1_t, b1_row, w_heads, b_heads))

    mu, sigma = encoder_forward(x, w1_t, b1_row, w_heads, b_heads,
                                latent_dim=latent_dim)
    mu, sigma = jax.block_until_ready((mu, sigma))

    # Sanity check against a pure-JAX reference of the PyTorch forward.
    mu_ref, sigma_ref = reference_forward(x, w1, b1, wmu, bmu, wlv, blv)
    assert jnp.allclose(mu, mu_ref, atol=1e-5, rtol=1e-5)
    assert jnp.allclose(sigma, sigma_ref, atol=1e-5, rtol=1e-5)

    print("KERNEL_OK")
</pallas_src>

<mosaic_0001>
module attributes {stable_mosaic.version = 11 : i64} {
  func.func @encoder_kernel(%arg0: memref<4x768xf32, #tpu.memory_space<vmem>>, %arg1: memref<768x32xf32, #tpu.memory_space<vmem>>, %arg2: memref<1x32xf32, #tpu.memory_space<vmem>>, %arg3: memref<32x128xf32, #tpu.memory_space<vmem>>, %arg4: memref<1x128xf32, #tpu.memory_space<vmem>>, %arg5: memref<4x128xf32, #tpu.memory_space<vmem>>) attributes {dimension_semantics = [], scalar_prefetch = 0 : i64, scratch_operands = 0 : i64, tpu.core_type = #tpu.core_type<tc>} {
    %c0 = arith.constant 0 : index
    %c0_0 = arith.constant 0 : index
    %0 = vector.load %arg0[%c0, %c0_0] : memref<4x768xf32, #tpu.memory_space<vmem>>, vector<4x768xf32>
    %c0_1 = arith.constant 0 : index
    %c0_2 = arith.constant 0 : index
    %1 = vector.load %arg1[%c0_1, %c0_2] : memref<768x32xf32, #tpu.memory_space<vmem>>, vector<768x32xf32>
    %cst = arith.constant dense<0.000000e+00> : vector<4x32xf32>
    %2 = tpu.matmul %0, %1, %cst {dimension_numbers = #tpu.dot_dimension_numbers<[1], [0], [0], [1], [0, 0, 1, 1], [], []>} : vector<4x768xf32>, vector<768x32xf32>, vector<4x32xf32> -> vector<4x32xf32>
    %c0_3 = arith.constant 0 : index
    %c0_4 = arith.constant 0 : index
    %3 = vector.load %arg2[%c0_3, %c0_4] : memref<1x32xf32, #tpu.memory_space<vmem>>, vector<1x32xf32>
    %4 = vector.broadcast %3 : vector<1x32xf32> to vector<4x32xf32>
    %5 = arith.addf %2, %4 : vector<4x32xf32>
    %cst_5 = arith.constant 0.000000e+00 : f32
    %6 = vector.broadcast %cst_5 : f32 to vector<4x32xf32>
    %7 = arith.maximumf %5, %6 : vector<4x32xf32>
    %c0_6 = arith.constant 0 : index
    %c0_7 = arith.constant 0 : index
    %8 = vector.load %arg3[%c0_6, %c0_7] : memref<32x128xf32, #tpu.memory_space<vmem>>, vector<32x128xf32>
    %cst_8 = arith.constant dense<0.000000e+00> : vector<4x128xf32>
    %9 = tpu.matmul %7, %8, %cst_8 {dimension_numbers = #tpu.dot_dimension_numbers<[1], [0], [0], [1], [0, 0, 1, 1], [], []>} : vector<4x32xf32>, vector<32x128xf32>, vector<4x128xf32> -> vector<4x128xf32>
    %c0_9 = arith.constant 0 : index
    %c0_10 = arith.constant 0 : index
    %10 = vector.load %arg4[%c0_9, %c0_10] : memref<1x128xf32, #tpu.memory_space<vmem>>, vector<1x128xf32>
    %11 = vector.broadcast %10 : vector<1x128xf32> to vector<4x128xf32>
    %12 = arith.addf %9, %11 : vector<4x128xf32>
    %13 = tpu.iota {dimensions = array<i32: 1>} : vector<4x128xi32>
    %c10_i32 = arith.constant 10 : i32
    %14 = vector.broadcast %c10_i32 : i32 to vector<4x128xi32>
    %15 = arith.cmpi slt, %13, %14 : vector<4x128xi32>
    %16 = math.exp %12 : vector<4x128xf32>
    %17 = arith.select %15, %12, %16 : vector<4x128xi1>, vector<4x128xf32>
    %c0_11 = arith.constant 0 : index
    %c0_12 = arith.constant 0 : index
    %18 = vector.load %arg5[%c0_11, %c0_12] : memref<4x128xf32, #tpu.memory_space<vmem>>, vector<4x128xf32>
    tpu.vector_store %arg5[%c0_11, %c0_12], %17 {strides = array<i32>} : memref<4x128xf32, #tpu.memory_space<vmem>>, vector<4x128xf32>,
    return
  }
}

</mosaic_0001>

<bundles_post_ra>
// kernel: encoder_forward_packed.1
= control target key start
LH: loop header
LB: loop body
LE: loop exit
PB: predicated region body
PF: predicated region fallthrough
CT: control target
= control target key end

     0   :  { %s1073_s0 = inlined_call_operand.vmem [shape: f32[4,768], index: 0, kind: input, shape index: {}]   ;;  %s1074_s1 = inlined_call_operand.vmem [shape: f32[768,32], index: 1, kind: input, shape index: {}]   ;;  %s1075_s2 = inlined_call_operand.vmem [shape: f32[1,32], index: 2, kind: input, shape index: {}]   ;;  %s1076_s3 = inlined_call_operand.vmem [shape: f32[32,128], index: 3, kind: input, shape index: {}]   ;;  %s1077_s4 = inlined_call_operand.vmem [shape: f32[1,128], index: 4, kind: input, shape index: {}]   ;;  %s1078_s5 = inlined_call_operand.hbm [shape: f32[4,128], index: 5, kind: output, shape index: {}]  }
   0x1   :  { %v40_v0 = vld [vmem:[%s1074_s1 + $0x80] sm:$0xff]  ;;  %v41_v1 = vld [vmem:[%s1074_s1 + $0x88] sm:$0xff]  ;;  %v42_v11 = vld [vmem:[%s1074_s1 + $0x90] sm:$0xff] }
   0x2   :  { %v24_v2 = vld [vmem:[%s1074_s1] sm:$0xff]  ;;  %v577_v3 = vpack.c.bf16 %v41_v1, %v40_v0  ;;  %v25_v4 = vld [vmem:[%s1074_s1 + $0x8] sm:$0xff]  ;;  %v43_v13 = vld [vmem:[%s1074_s1 + $0x98] sm:$0xff] }
   0x3   :  { %v72_v5 = vld [vmem:[%s1074_s1 + $0x180] sm:$0xff]  ;;  %v73_v6 = vld [vmem:[%s1074_s1 + $0x188] sm:$0xff]  ;;  %v579_v7 = vpack.c.bf16 %v25_v4, %v24_v2  ;;  %v26_v14 = vld [vmem:[%s1074_s1 + $0x10] sm:$0xff]  ;;  %v581_v16 = vpack.c.bf16 %v43_v13, %v42_v11 }
   0x4   :  { %v609_v8 = vpack.c.bf16 %v73_v6, %v72_v5  ;;  %v56_v9 = vld [vmem:[%s1074_s1 + $0x100] sm:$0xff]  ;;  %v57_v10 = vld [vmem:[%s1074_s1 + $0x108] sm:$0xff]  ;;  %578 = vmatprep.subr.bf16.mxu0 %v577_v3  ;;  %v27_v15 = vld [vmem:[%s1074_s1 + $0x18] sm:$0xff] }
   0x5   :  { %v611_v12 = vpack.c.bf16 %v57_v10, %v56_v9  ;;  %580 = vmatpush3.bf16.msra.mxu0 %v579_v7  ;;  %v583_v17 = vpack.c.bf16 %v27_v15, %v26_v14  ;;  %v74_v18 = vld [vmem:[%s1074_s1 + $0x190] sm:$0xff]  ;;  %v75_v19 = vld [vmem:[%s1074_s1 + $0x198] sm:$0xff]  ;;  %v44_v23 = vld [vmem:[%s1074_s1 + $0xa0] sm:$0xff] }
   0x6   :  { %610 = vmatprep.subr.bf16.mxu1 %v609_v8  ;;  %v58_v20 = vld [vmem:[%s1074_s1 + $0x110] sm:$0xff]  ;;  %v613_v21 = vpack.c.bf16 %v75_v19, %v74_v18  ;;  %v59_v22 = vld [vmem:[%s1074_s1 + $0x118] sm:$0xff]  ;;  %v45_v24 = vld [vmem:[%s1074_s1 + $0xa8] sm:$0xff]  ;;  %582 = vmatprep.subr.bf16.mxu0 %v581_v16 }
   0x7   :  { %612 = vmatpush3.bf16.msra.mxu1 %v611_v12  ;;  %v615_v25 = vpack.c.bf16 %v59_v22, %v58_v20  ;;  %v585_v26 = vpack.c.bf16 %v45_v24, %v44_v23  ;;  %v28_v27 = vld [vmem:[%s1074_s1 + $0x20] sm:$0xff]  ;;  %v29_v28 = vld [vmem:[%s1074_s1 + $0x28] sm:$0xff]  ;;  %v46_v35 = vld [vmem:[%s1074_s1 + $0xb0] sm:$0xff] }
   0x8   :  { %v76_v29 = vld [vmem:[%s1074_s1 + $0x1a0] sm:$0xff]  ;;  %614 = vmatprep.subr.bf16.mxu1 %v613_v21  ;;  %v77_v30 = vld [vmem:[%s1074_s1 + $0x1a8] sm:$0xff]  ;;  %v587_v33 = vpack.c.bf16 %v29_v28, %v28_v27  ;;  %v47_v36 = vld [vmem:[%s1074_s1 + $0xb8] sm:$0xff] }
   0x9   :  { %v60_v31 = vld [vmem:[%s1074_s1 + $0x120] sm:$0xff]  ;;  %v61_v32 = vld [vmem:[%s1074_s1 + $0x128] sm:$0xff]  ;;  %584 = vmatpush3.bf16.msra.mxu0 %v583_v17  ;;  %v617_v34 = vpack.c.bf16 %v77_v30, %v76_v29  ;;  %v30_v37 = vld [vmem:[%s1074_s1 + $0x30] sm:$0xff]  ;;  %v589_v39 = vpack.c.bf16 %v47_v36, %v46_v35 }
   0xa   :  { %586 = vmatprep.subr.bf16.mxu0 %v585_v26  ;;  %v619_v38 = vpack.c.bf16 %v61_v32, %v60_v31  ;;  %v31_v40 = vld [vmem:[%s1074_s1 + $0x38] sm:$0xff]  ;;  %v78_v41 = vld [vmem:[%s1074_s1 + $0x1b0] sm:$0xff]  ;;  %v48_v46 = vld [vmem:[%s1074_s1 + $0xc0] sm:$0xff] }
   0xb   :  { %616 = vmatpush3.bf16.msra.mxu1 %v615_v25  ;;  %v79_v42 = vld [vmem:[%s1074_s1 + $0x1b8] sm:$0xff]  ;;  %v62_v44 = vld [vmem:[%s1074_s1 + $0x130] sm:$0xff]  ;;  %v49_v47 = vld [vmem:[%s1074_s1 + $0xc8] sm:$0xff]  ;;  %v591_v48 = vpack.c.bf16 %v31_v40, %v30_v37 }
   0xc   :  { %618 = vmatprep.subr.bf16.mxu1 %v617_v34  ;;  %v621_v43 = vpack.c.bf16 %v79_v42, %v78_v41  ;;  %v63_v45 = vld [vmem:[%s1074_s1 + $0x138] sm:$0xff]  ;;  %v80_v49 = vld [vmem:[%s1074_s1 + $0x1c0] sm:$0xff]  ;;  %v81_v50 = vld [vmem:[%s1074_s1 + $0x1c8] sm:$0xff]  ;;  %v593_v52 = vpack.c.bf16 %v49_v47, %v48_v46 }
   0xd   :  { %588 = vmatpush3.bf16.msra.mxu0 %v587_v33  ;;  %v623_v51 = vpack.c.bf16 %v63_v45, %v62_v44  ;;  %v32_v53 = vld [vmem:[%s1074_s1 + $0x40] sm:$0xff]  ;;  %v33_v54 = vld [vmem:[%s1074_s1 + $0x48] sm:$0xff]  ;;  %v625_v56 = vpack.c.bf16 %v81_v50, %v80_v49  ;;  %v50_v58 = vld [vmem:[%s1074_s1 + $0xd0] sm:$0xff] }
   0xe   :  { %590 = vmatprep.subr.bf16.mxu0 %v589_v39  ;;  %v64_v55 = vld [vmem:[%s1074_s1 + $0x140] sm:$0xff]  ;;  %v65_v57 = vld [vmem:[%s1074_s1 + $0x148] sm:$0xff]  ;;  %v51_v59 = vld [vmem:[%s1074_s1 + $0xd8] sm:$0xff]  ;;  %v595_v62 = vpack.c.bf16 %v33_v54, %v32_v53 }
   0xf   :  { %620 = vmatpush3.bf16.msra.mxu1 %v619_v38  ;;  %v82_v60 = vld [vmem:[%s1074_s1 + $0x1d0] sm:$0xff]  ;;  %v83_v61 = vld [vmem:[%s1074_s1 + $0x1d8] sm:$0xff]  ;;  %v627_v63 = vpack.c.bf16 %v65_v57, %v64_v55  ;;  %v597_v0 = vpack.c.bf16 %v51_v59, %v50_v58  ;;  %v52_v6 = vld [vmem:[%s1074_s1 + $0xe0] sm:$0xff] }
  0x10   :  { %622 = vmatprep.subr.bf16.mxu1 %v621_v43  ;;  %v34_v1 = vld [vmem:[%s1074_s1 + $0x50] sm:$0xff]  ;;  %v35_v2 = vld [vmem:[%s1074_s1 + $0x58] sm:$0xff]  ;;  %v629_v4 = vpack.c.bf16 %v83_v61, %v82_v60  ;;  %v53_v7 = vld [vmem:[%s1074_s1 + $0xe8] sm:$0xff] }
  0x11   :  { %592 = vmatpush3.bf16.msra.mxu0 %v591_v48  ;;  %v66_v3 = vld [vmem:[%s1074_s1 + $0x150] sm:$0xff]  ;;  %v67_v5 = vld [vmem:[%s1074_s1 + $0x158] sm:$0xff]  ;;  %v84_v8 = vld [vmem:[%s1074_s1 + $0x1e0] sm:$0xff]  ;;  %v599_v10 = vpack.c.bf16 %v35_v2, %v34_v1  ;;  %v601_v14 = vpack.c.bf16 %v53_v7, %v52_v6 }
  0x12   :  { %594 = vmatprep.subr.bf16.mxu0 %v593_v52  ;;  %v85_v9 = vld [vmem:[%s1074_s1 + $0x1e8] sm:$0xff]  ;;  %v36_v11 = vld [vmem:[%s1074_s1 + $0x60] sm:$0xff]  ;;  %v631_v13 = vpack.c.bf16 %v67_v5, %v66_v3  ;;  %v54_v20 = vld [vmem:[%s1074_s1 + $0xf0] sm:$0xff] }
  0x13   :  { %624 = vmatpush3.bf16.msra.mxu1 %v623_v51  ;;  %v21_v12 = vld [vmem:[%s1073_s0] sm:$0xff]  ;;  %v37_v15 = vld [vmem:[%s1074_s1 + $0x68] sm:$0xff]  ;;  %v633_v19 = vpack.c.bf16 %v85_v9, %v84_v8  ;;  %v55_v21 = vld [vmem:[%s1074_s1 + $0xf8] sm:$0xff] }
  0x14   :  { %626 = vmatprep.subr.bf16.mxu1 %v625_v56  ;;  %v68_v16 = vld [vmem:[%s1074_s1 + $0x160] sm:$0xff]  ;;  %v69_v17 = vld [vmem:[%s1074_s1 + $0x168] sm:$0xff]  ;;  %v130_v18 = vcombine.high %v21_v12, %v21_v12  ;;  %v86_v23 = vld [vmem:[%s1074_s1 + $0x1f0] sm:$0xff]  ;;  %v603_v26 = vpack.c.bf16 %v37_v15, %v36_v11  ;;  %v605_v28 = vpack.c.bf16 %v55_v21, %v54_v20 }
  0x15   :  { %596 = vmatpush3.bf16.msra.mxu0 %v595_v62  ;;  %v22_v22 = vld [vmem:[%s1073_s0 + $0x8] sm:$0xff]  ;;  %v87_v24 = vld [vmem:[%s1074_s1 + $0x1f8] sm:$0xff]  ;;  %v635_v27 = vpack.c.bf16 %v69_v17, %v68_v16  ;;  %v38_v29 = vld [vmem:[%s1074_s1 + $0x70] sm:$0xff] }
  0x16   :  { %598 = vmatprep.subr.bf16.mxu0 %v597_v0  ;;  %200 = vmatprep.mubr.f32.mxu0 %v130_v18  ;;  %v131_v25 = vcombine.high %v22_v22, %v22_v22  ;;  %v39_v30 = vld [vmem:[%s1074_s1 + $0x78] sm:$0xff]  ;;  %v70_v31 = vld [vmem:[%s1074_s1 + $0x170] sm:$0xff]  ;;  %v637_v32 = vpack.c.bf16 %v87_v24, %v86_v23  ;;  %v104_v34 = vld [vmem:[%s1074_s1 + $0x280] sm:$0xff] }
  0x17   :  { %628 = vmatpush3.bf16.msra.mxu1 %v627_v63  ;;  %v71_v33 = vld [vmem:[%s1074_s1 + $0x178] sm:$0xff]  ;;  %v105_v35 = vld [vmem:[%s1074_s1 + $0x288] sm:$0xff]  ;;  %v607_v36 = vpack.c.bf16 %v39_v30, %v38_v29  ;;  %v88_v39 = vld [vmem:[%s1074_s1 + $0x200] sm:$0xff] }
  0x18   :  { %630 = vmatprep.subr.bf16.mxu1 %v629_v4  ;;  %270 = vmatprep.mubr.f32.mxu1 %v131_v25  ;;  %v639_v37 = vpack.c.bf16 %v71_v33, %v70_v31  ;;  %v641_v38 = vpack.c.bf16 %v105_v35, %v104_v34  ;;  %v89_v40 = vld [vmem:[%s1074_s1 + $0x208] sm:$0xff]  ;;  %v106_v41 = vld [vmem:[%s1074_s1 + $0x290] sm:$0xff]  ;;  %v107_v42 = vld [vmem:[%s1074_s1 + $0x298] sm:$0xff] }
  0x19   :  { %600 = vmatpush3.bf16.msra.mxu0 %v599_v10  ;;  %v643_v43 = vpack.c.bf16 %v89_v40, %v88_v39  ;;  %v23_v44 = vld [vmem:[%s1073_s0 + $0x10] sm:$0xff]  ;;  %v645_v45 = vpack.c.bf16 %v107_v42, %v106_v41  ;;  %v91_v47 = vld [vmem:[%s1074_s1 + $0x218] sm:$0xff] }
  0x1a   :  { %602 = vmatprep.subr.bf16.mxu0 %v601_v14  ;;  %v90_v46 = vld [vmem:[%s1074_s1 + $0x210] sm:$0xff]  ;;  %v132_v48 = vcombine.high %v23_v44, %v23_v44 }
  0x1b   :  { %632 = vmatpush3.bf16.msra.mxu1 %v631_v13 }
  0x1c   :  { %634 = vmatprep.subr.bf16.mxu1 %v633_v19 }
  0x1d   :  { %604 = vmatpush3.bf16.msra.mxu0 %v603_v26 }
  0x1e   :  { %606 = vmatprep.subr.bf16.mxu0 %v605_v28 }
  0x1f   :  { %636 = vmatpush3.bf16.msra.mxu1 %v635_v27 }
  0x20   :  { %638 = vmatprep.subr.bf16.mxu1 %v637_v32 }
  0x21   :  { %608 = vmatpush3.bf16.msra.mxu0 %v607_v36 }
  0x22   :  { %642 = vmatprep.subr.bf16.mxu0 %v641_v38 }
  0x23   :  { %640 = vmatpush3.bf16.msra.mxu1 %v639_v37 }
  0x24   :  { %10 = vsyncpa [#allocation3], 0  ;;  %v108_v49 = vld [vmem:[%s1074_s1 + $0x2a0] sm:$0xff]  ;;  %v109_v50 = vld [vmem:[%s1074_s1 + $0x2a8] sm:$0xff]  ;;  %201 = vmatmul.mubr.f32.vlgmr.msra.gmra.mrb[0].mxu0 %v21_v12  ;;  %v647_v51 = vpack.c.bf16 %v91_v47, %v90_v46  ;;  %v712_v25 = vmov 0.0|0.0   ;;  %vm713_vm0 = vmmov 0  }
  0x25   :  { %644 = vmatpush3.bf16.msra.mxu0 %v643_v43  ;;  %v649_v52 = vpack.c.bf16 %v109_v50, %v108_v49  ;;  %v92_v53 = vld [vmem:[%s1074_s1 + $0x220] sm:$0xff]  ;;  %v93_v54 = vld [vmem:[%s1074_s1 + $0x228] sm:$0xff]  ;;  %340 = vmatprep.mubr.f32.mxu0 %v132_v48  ;;  %v110_v55 = vld [vmem:[%s1074_s1 + $0x2b0] sm:$0xff]  ;;  %v714_v29 = vmov 0.0   ;;  %vm358_vm1 = vcmask 261120   ;;  %v432_v49 = vlaneseq }
  0x26   :  { %271 = vmatmul.mubr.f32.vlgmr.msra.gmra.mrb[0].mxu1 %v22_v22  ;;  %646 = vmatprep.subr.bf16.mxu0 %v645_v45  ;;  %v111_v56 = vld [vmem:[%s1074_s1 + $0x2b8] sm:$0xff]  ;;  %v651_v57 = vpack.c.bf16 %v93_v54, %v92_v53  ;;  %v94_v59 = vld [vmem:[%s1074_s1 + $0x230] sm:$0xff]  ;;  %v112_v61 = vld [vmem:[%s1074_s1 + $0x2c0] sm:$0xff] }
  0x27   :  { %v653_v58 = vpack.c.bf16 %v111_v56, %v110_v55  ;;  %v95_v60 = vld [vmem:[%s1074_s1 + $0x238] sm:$0xff]  ;;  %v113_v62 = vld [vmem:[%s1074_s1 + $0x2c8] sm:$0xff]  ;;  %v96_v1 = vld [vmem:[%s1074_s1 + $0x240] sm:$0xff]  ;;  %673 = vmatprep.subr.bf16.mxu1 %v712_v25  ;;  %574 = vmatprep.mubr.msk.f32.mxu1 %vm713_vm0, %v714_v29  ;;  %v433_v50 = vand.u32 127, %v432_v49 }
  0x28   :  { %v655_v63 = vpack.c.bf16 %v95_v60, %v94_v59  ;;  %v657_v0 = vpack.c.bf16 %v113_v62, %v112_v61  ;;  %v97_v2 = vld [vmem:[%s1074_s1 + $0x248] sm:$0xff]  ;;  %v114_v3 = vld [vmem:[%s1074_s1 + $0x2d0] sm:$0xff]  ;;  %v115_v4 = vld [vmem:[%s1074_s1 + $0x2d8] sm:$0xff] }
  0x29   :  { %648 = vmatpush3.bf16.msra.mxu0 %v647_v51  ;;  %v659_v5 = vpack.c.bf16 %v97_v2, %v96_v1  ;;  %v661_v6 = vpack.c.bf16 %v115_v4, %v114_v3  ;;  %v98_v7 = vld [vmem:[%s1074_s1 + $0x250] sm:$0xff]  ;;  %v99_v8 = vld [vmem:[%s1074_s1 + $0x258] sm:$0xff]  ;;  %v116_v9 = vld [vmem:[%s1074_s1 + $0x2e0] sm:$0xff]  ;;  %vm434_vm2 = vcmp.lt.s32.totalorder %v433_v50, 10 }
  0x2a   :  { %650 = vmatprep.subr.bf16.mxu0 %v649_v52  ;;  %v117_v10 = vld [vmem:[%s1074_s1 + $0x2e8] sm:$0xff]  ;;  %v663_v11 = vpack.c.bf16 %v99_v8, %v98_v7  ;;  %v100_v13 = vld [vmem:[%s1074_s1 + $0x260] sm:$0xff]  ;;  %v118_v15 = vld [vmem:[%s1074_s1 + $0x2f0] sm:$0xff] }
  0x2b   :  { %v665_v12 = vpack.c.bf16 %v117_v10, %v116_v9  ;;  %v101_v14 = vld [vmem:[%s1074_s1 + $0x268] sm:$0xff]  ;;  %v119_v16 = vld [vmem:[%s1074_s1 + $0x2f8] sm:$0xff]  ;;  %v102_v19 = vld [vmem:[%s1074_s1 + $0x270] sm:$0xff] }
  0x2c   :  { %v667_v17 = vpack.c.bf16 %v101_v14, %v100_v13  ;;  %v669_v18 = vpack.c.bf16 %v119_v16, %v118_v15  ;;  %v103_v20 = vld [vmem:[%s1074_s1 + $0x278] sm:$0xff]  ;;  %v347_v22 = vld [vmem:[%s1076_s3] sm:$0xff]  ;;  %v348_v23 = vld [vmem:[%s1076_s3 + $0x8] sm:$0xff] }
  0x2d   :  { %652 = vmatpush3.bf16.msra.mxu0 %v651_v57  ;;  %v671_v21 = vpack.c.bf16 %v103_v20, %v102_v19  ;;  %v674_v24 = vpack.c.bf16 %v348_v23, %v347_v22  ;;  %v349_v26 = vld [vmem:[%s1076_s3 + $0x10] sm:$0xff]  ;;  %v350_v27 = vld [vmem:[%s1076_s3 + $0x18] sm:$0xff]  ;;  %v453_v31 = vld [vmem:[%s1075_s2] ss:$0 sm:$0xff]  ;;  %s715_s2 = smov [#allocation2]  }
  0x2e   :  { %654 = vmatprep.subr.bf16.mxu0 %v653_v58  ;;  %v677_v28 = vpack.c.bf16 %v350_v27, %v349_v26  ;;  %s445_s23 = sshll.u32 %s715_s2, 4  ;;  %s446_s23 = int_to_ptr.vmem [resolvable:$true] %s445_s23 }
  0x2f   :  { %675 = vmatpush3.bf16.msra.mxu1 %v674_v24  ;;  %s688_s24 = scalar_lea.vmem %s446_s23, 64  ;;  %p693_p1 = scmp.lt.s32.totalorder %s446_s23, %s446_s23 }
  0x30   :  { %676 = vmatprep.subr.bf16.mxu1 %v712_v25  ;;  %p689_p0 = scmp.ne.s32.totalorder %s446_s23, %s688_s24  ;;  %p694_p2 = scmp.lt.s32.totalorder %s688_s24, %s688_s24 }
  0x31   :  { %656 = vmatpush3.bf16.msra.mxu0 %v655_v63 }
  0x32   :  { %658 = vmatprep.subr.bf16.mxu0 %v657_v0  ;;  %p695_p3 = por %p694_p2, %p693_p1 }
  0x33   :  { %678 = vmatpush3.bf16.msra.mxu1 %v677_v28 }
  0x34   :  { %p696_p4 = pnand %p695_p3, %p689_p0 }
  0x35   :  { %660 = vmatpush3.bf16.msra.mxu0 %v659_v5 }
  0x36   :  { %662 = vmatprep.subr.bf16.mxu0 %v661_v6 }
  0x39   :  { %664 = vmatpush3.bf16.msra.mxu0 %v663_v11 }
  0x3a   :  { %666 = vmatprep.subr.bf16.mxu0 %v665_v12 }
  0x3d   :  { %668 = vmatpush3.bf16.msra.mxu0 %v667_v17 }
  0x3e   :  { %670 = vmatprep.subr.bf16.mxu0 %v669_v18 }
  0x41   :  { %672 = vmatpush3.bf16.msra.mxu0 %v671_v21 }
  0x44   :  { %341 = vmatmul.mubr.f32.vlgmr.msra.gmra.mrb[2].mxu0 %v23_v44  ;;  %v454_v44 = vld [vmem:[%s1077_s4] ss:$0 sm:$0xff] }
  0xf7   :  { %v488_v30 = vpop.f32.mrb[0].mxu0 }
  0xf8   :  { %v489_v32 = vpop.f32.mrb[1].mxu0 }
  0xf9   :  { %v523_v33 = vpop.f32.mrb[0].mxu1  ;;  %v490_v34 = vadd.f32 %v489_v32, %v488_v30 }
  0xfa   :  { %v524_v35 = vpop.f32.mrb[1].mxu1 }
  0xfb   :  { %v525_v36 = vadd.f32 %v524_v35, %v523_v33  ;;  %v203_v37 = vadd.f32 %v490_v34, %v453_v31 }
  0xfd   :  { %v273_v38 = vadd.f32 %v525_v36, %v203_v37 }
 0x117   :  { %v558_v39 = vpop.f32.mrb[2].mxu0 }
 0x118   :  { %v559_v40 = vpop.f32.mrb[3].mxu0 }
 0x119   :  { %v560_v41 = vadd.f32 %v559_v40, %v558_v39 }
 0x11b   :  { %v343_v42 = vadd.f32 %v560_v41, %v273_v38 }
 0x11d   :  { %v346_v43 = vmax.f32 %v343_v42, 0.0 }
 0x11f   :  { %575 = vmatmul.mubr.msk.f32.vlgmr.msra.gmra.mrb[2].mxu1 %vm358_vm1, %v346_v43 }
 0x1f2   :  { %v428_v45 = vpop.f32.mrb[2].mxu1 }
 0x1f3   :  { %v429_v46 = vadd.f32 %v454_v44, %v428_v45  ;;  %v576_v47 = vpop.f32.mrb[3].mxu1 }
 0x1f5   :  { %v435_v48 = vmul.f32 1.442695, %v429_v46 }
 0x1f7   :  { %686 = vpow2.f32 %v435_v48 }
 0x201   :  { %v687_v51 = vpop.eup %686 }
 0x202   :  { %v437_v52 = vsel %vm434_vm2, %v429_v46, %v687_v51 }
 0x203   :  { %438 = vst [vmem:[#allocation2] sm:$0xf] %v437_v52 }
 0x204   :  { %699 = shalt.err (!%p696_p4)
}
 0x205   :  { %s700_s26 = scalar_lea.hbm %s1078_s5, 64 }
 0x206   :  { %p701_p5 = scmp.ne.s32.totalorder %s1078_s5, %s700_s26  ;;  %p704_p6 = scmp.lt.u32.totalorder %s700_s26, %s1078_s5 }
 0x208   :  { %p706_p7 = pnand %p704_p6, %p701_p5 }
 0x20a   :  { %709 = shalt.err (!%p706_p7)
}
 0x20b   :  { %448 = dma.vmem_to_hbm [thread:$0]  %s446_s23, 64, %s1078_s5, [#allocation3]  }
 0x20c   :  { %710 = dma.done.wait [#allocation3], 64  }
 0x20d   :  { %711 = vsyncadd [#allocation3], 4294967232 }
 0x20e   :  { %452 = vsyncpa [#allocation3], 1 }

</bundles_post_ra>
